<compile_context>
chip_gen: v5e
topology: v5e:2x2
jax: 0.10.0
libtpu: 0.0.40
codegen_flags: <defaults>
</compile_context>

<pallas_src>
import functools

import jax
import jax.numpy as jnp
from jax.experimental import pallas as pl
from jax.experimental.pallas import tpu as pltpu

IN_FEAT = 2 + 4 + 3 + 4   # 13 = [x, y] + n_embed(4) + l_embed(3) + m_embed(4)
IN_PAD = 16               # feature dim padded to 16 (zero cols -> matmul no-op)
H1, H2, OUT = 128, 64, 2
OUT_PAD = 8               # output lane-padded to 8 cols; cols 2..7 are zeros
TB_MAX = 2048             # max batch tile (multiple of 256 for v6e/v7x MXU)


def _round_up(x, m):
    return (x + m - 1) // m * m


def _pick_tile(batch):
    """Batch tile: a single 8-aligned tile for tiny batches; otherwise a
    256-aligned tile capped at TB_MAX, chosen so the grid keeps >= 2 steps
    (v7x megacore can then shard the "parallel" batch axis across both TCs)."""
    if batch <= 256:
        return max(8, _round_up(batch, 8))
    half = (batch + 1) // 2
    return min(TB_MAX, _round_up(half, 256))


def _use_bf16_tanh():
    """bf16 tanh only on chips whose VPU/EUP have a bf16 path (v6e / v7x)."""
    try:
        kind = jax.devices()[0].device_kind.lower()
    except Exception:
        return False
    return ("v6" in kind) or ("v7" in kind)


BF16_TANH = _use_bf16_tanh()


# ----------------------------------------------------------------------------
# Kernel
# ----------------------------------------------------------------------------
def mlp_kernel(x_ref, w1_ref, b1_ref, w2_ref, b2_ref, w3_ref, b3_ref, o_ref,
               *, bf16_tanh):
    def act(acc_f32):
        # v6e/v7x: cast the f32 accumulate once to bf16, tanh in bf16 (bf16
        # EUP), result feeds the next bf16 matmul directly (no extra cast).
        # v5e: f32 tanh (no bf16 EUP path), then cast for the next matmul.
        if bf16_tanh:
            return jnp.tanh(acc_f32.astype(jnp.bfloat16))
        return jnp.tanh(acc_f32).astype(jnp.bfloat16)

    # Layer 1: Linear(13 -> 128) + Tanh   (bf16 matmul, f32 accumulate)
    h = act(jnp.dot(x_ref[...], w1_ref[...],
                    preferred_element_type=jnp.float32) + b1_ref[...])
    # TODO(synk): nn.Dropout(p=0.1) is identity in eval mode; not applied here.
    # Layer 2: Linear(128 -> 64) + Tanh
    h = act(jnp.dot(h, w2_ref[...],
                    preferred_element_type=jnp.float32) + b2_ref[...])
    # Layer 3: Linear(64 -> 2), lane-padded to 8 output columns (zeros beyond 2)
    o_ref[...] = jnp.dot(h, w3_ref[...],
                         preferred_element_type=jnp.float32) + b3_ref[...]


def mlp_pallas(x_bf16, w1, b1, w2, b2, w3, b3, tb, bf16_tanh):
    bp = x_bf16.shape[0]
    assert bp % tb == 0
    grid = (bp // tb,)
    kernel = functools.partial(mlp_kernel, bf16_tanh=bf16_tanh)
    return pl.pallas_call(
        kernel,
        out_shape=jax.ShapeDtypeStruct((bp, OUT_PAD), jnp.float32),
        grid_spec=pltpu.PrefetchScalarGridSpec(
            num_scalar_prefetch=0,
            grid=grid,
            in_specs=[
                # activations: tiled over batch
                pl.BlockSpec((tb, IN_PAD), lambda i: (i, 0)),
                # weights/biases: constant index_maps -> kept resident by the
                # pipeline (no per-step re-DMA of grid-invariant blocks)
                pl.BlockSpec((IN_PAD, H1), lambda i: (0, 0)),    # W1 (K rows padded)
                pl.BlockSpec((1, H1), lambda i: (0, 0)),         # b1
                pl.BlockSpec((H1, H2), lambda i: (0, 0)),        # W2
                pl.BlockSpec((1, H2), lambda i: (0, 0)),         # b2
                pl.BlockSpec((H2, OUT_PAD), lambda i: (0, 0)),   # W3 (N cols padded)
                pl.BlockSpec((1, OUT_PAD), lambda i: (0, 0)),    # b3 (padded)
            ],
            out_specs=pl.BlockSpec((tb, OUT_PAD), lambda i: (i, 0)),
        ),
        compiler_params=pltpu.CompilerParams(
            dimension_semantics=("parallel",)),
    )(x_bf16, w1, b1, w2, b2, w3, b3)


# ----------------------------------------------------------------------------
# Parameters (match PyTorch defaults) and one-time kernel-ready packing
# ----------------------------------------------------------------------------
def init_params(key):
    ks = jax.random.split(key, 9)

    def uniform(k, shape, fan_in):
        bound = 1.0 / jnp.sqrt(jnp.float32(fan_in))
        return jax.random.uniform(k, shape, jnp.float32, -bound, bound)

    return dict(
        # nn.Embedding default init: N(0, 1)
        n_emb=jax.random.normal(ks[0], (5, 4), jnp.float32),
        l_emb=jax.random.normal(ks[1], (4, 3), jnp.float32),
        m_emb=jax.random.normal(ks[2], (7, 4), jnp.float32),
        # nn.Linear default init: U(-1/sqrt(fan_in), 1/sqrt(fan_in))
        w1=uniform(ks[3], (IN_FEAT, H1), IN_FEAT),
        b1=uniform(ks[4], (H1,), IN_FEAT),
        w2=uniform(ks[5], (H1, H2), H1),
        b2=uniform(ks[6], (H2,), H1),
        w3=uniform(ks[7], (H2, OUT), H2),
        b3=uniform(ks[8], (OUT,), H2),
    )


def prepare_kernel_params(params):
    """One-time (hoisted out of the forward path) padding / bf16 casting of
    the f32 params into kernel-ready arrays. Zero-padding of W1's K rows and
    W3/b3's output columns is a mathematical no-op."""
    w1 = jnp.zeros((IN_PAD, H1), jnp.bfloat16).at[:IN_FEAT, :].set(
        params["w1"].astype(jnp.bfloat16))
    w3 = jnp.zeros((H2, OUT_PAD), jnp.bfloat16).at[:, :OUT].set(
        params["w3"].astype(jnp.bfloat16))
    b3 = jnp.zeros((1, OUT_PAD), jnp.float32).at[0, :OUT].set(params["b3"])
    return dict(
        n_emb=params["n_emb"].astype(jnp.bfloat16),
        l_emb=params["l_emb"].astype(jnp.bfloat16),
        m_emb=params["m_emb"].astype(jnp.bfloat16),
        w1=w1,
        b1=params["b1"][None, :].astype(jnp.float32),
        w2=params["w2"].astype(jnp.bfloat16),
        b2=params["b2"][None, :].astype(jnp.float32),
        w3=w3,
        b3=b3,
    )


# ----------------------------------------------------------------------------
# Forward
# ----------------------------------------------------------------------------
def build_inputs_padded(kparams, x, y, n, l, m, bp):
    """Build the (Bp, 16) bf16 activation slab directly (embeddings + spatial
    + zero feature padding + zero batch-row padding), single pass."""
    # TODO(synk): x/y are cast to bf16 here (~3 significant digits). If
    # wavefunction fidelity vs the f32 PyTorch model matters, keep the whole
    # layer-1 path (input slab + W1, K=16) in f32 instead — it's cheap.
    B = x.shape[0]
    n_embed = jnp.take(kparams["n_emb"], n, axis=0)        # (B, 4) bf16
    l_embed = jnp.take(kparams["l_emb"], l, axis=0)        # (B, 3) bf16
    m_embed = jnp.take(kparams["m_emb"], m + 3, axis=0)    # (B, 4) bf16
    feats = jnp.concatenate(
        [x[:, None].astype(jnp.bfloat16),
         y[:, None].astype(jnp.bfloat16),
         n_embed, l_embed, m_embed,
         jnp.zeros((B, IN_PAD - IN_FEAT), jnp.bfloat16)], axis=1)   # (B, 16)
    if bp > B:
        feats = jnp.pad(feats, ((0, bp - B), (0, 0)))
    return feats


@jax.jit
def wavefunction_nn_forward(kparams, x, y, n, l, m):
    B = x.shape[0]
    tb = _pick_tile(B)                 # static under jit (shape-derived)
    bp = _round_up(B, tb)              # padded batch rows are discarded below
    feats = build_inputs_padded(kparams, x, y, n, l, m, bp)
    out = mlp_pallas(feats, kparams["w1"], kparams["b1"], kparams["w2"],
                     kparams["b2"], kparams["w3"], kparams["b3"], tb, BF16_TANH)
    return out[:B, :OUT]


# ----------------------------------------------------------------------------
# References
# ----------------------------------------------------------------------------
def _build_inputs_f32(params, x, y, n, l, m):
    n_embed = jnp.take(params["n_emb"], n, axis=0)
    l_embed = jnp.take(params["l_emb"], l, axis=0)
    m_embed = jnp.take(params["m_emb"], m + 3, axis=0)
    return jnp.concatenate(
        [jnp.stack([x, y], axis=1), n_embed, l_embed, m_embed], axis=1)


def reference_forward_f32(params, x, y, n, l, m):
    inputs = _build_inputs_f32(params, x, y, n, l, m)
    h = jnp.tanh(inputs @ params["w1"] + params["b1"])
    h = jnp.tanh(h @ params["w2"] + params["b2"])
    return h @ params["w3"] + params["b3"]


def reference_forward_matched(params, x, y, n, l, m, bf16_tanh):
    # Mirrors the kernel numerics: bf16 inputs/weights, f32 accumulation,
    # tanh in bf16 (v6e/v7x) or f32 (v5e).
    def act(a):
        if bf16_tanh:
            return jnp.tanh(a.astype(jnp.bfloat16))
        return jnp.tanh(a).astype(jnp.bfloat16)

    inputs = _build_inputs_f32(params, x, y, n, l, m).astype(jnp.bfloat16)
    h = act(jnp.dot(inputs, params["w1"].astype(jnp.bfloat16),
                    preferred_element_type=jnp.float32) + params["b1"])
    h = act(jnp.dot(h, params["w2"].astype(jnp.bfloat16),
                    preferred_element_type=jnp.float32) + params["b2"])
    return jnp.dot(h, params["w3"].astype(jnp.bfloat16),
                   preferred_element_type=jnp.float32) + params["b3"]


# ----------------------------------------------------------------------------
# Self-test
# ----------------------------------------------------------------------------
if __name__ == "__main__":
    key = jax.random.PRNGKey(0)
    params = init_params(key)
    kparams = prepare_kernel_params(params)   # hoisted one-time padding/casting

    def run_case(B, case_key):
        kx, ky, kn, kl, km = jax.random.split(case_key, 5)
        x = jax.random.normal(kx, (B,), jnp.float32)
        y = jax.random.normal(ky, (B,), jnp.float32)
        n = jax.random.randint(kn, (B,), 0, 5)    # n_embedding has 5 rows
        l = jax.random.randint(kl, (B,), 0, 4)    # l_embedding has 4 rows
        m = jax.random.randint(km, (B,), -3, 4)   # m + 3 in [0, 6] -> 7 rows

        out = jax.block_until_ready(wavefunction_nn_forward(kparams, x, y, n, l, m))
        assert out.shape == (B, OUT), out.shape

        # Tight check vs a JAX reference with matched (bf16/f32) numerics.
        ref_m = reference_forward_matched(params, x, y, n, l, m, BF16_TANH)
        assert jnp.allclose(out, ref_m, atol=5e-3, rtol=5e-3), \
            "mismatch vs numerics-matched JAX reference"

        # Looser sanity check vs the all-f32 (PyTorch-equivalent) reference;
        # the gap is due to bf16 weights/activations, not the kernel.
        ref_f = reference_forward_f32(params, x, y, n, l, m)
        assert jnp.allclose(out, ref_f, atol=7.5e-2, rtol=7.5e-2), \
            "mismatch vs f32 JAX reference"

    run_case(8, jax.random.PRNGKey(1))     # tiny batch: single 8-row tile, grid = 1
    run_case(300, jax.random.PRNGKey(2))   # padded batch: tb = 256, grid = 2

    print("KERNEL_OK")
</pallas_src>

<mosaic_0001>
module attributes {stable_mosaic.version = 11 : i64} {
  func.func @mlp_kernel(%arg0: i32, %arg1: memref<8x16xbf16, #tpu.memory_space<vmem>>, %arg2: memref<16x128xbf16, #tpu.memory_space<vmem>>, %arg3: memref<1x128xf32, #tpu.memory_space<vmem>>, %arg4: memref<128x64xbf16, #tpu.memory_space<vmem>>, %arg5: memref<1x64xf32, #tpu.memory_space<vmem>>, %arg6: memref<64x8xbf16, #tpu.memory_space<vmem>>, %arg7: memref<1x8xf32, #tpu.memory_space<vmem>>, %arg8: memref<8x8xf32, #tpu.memory_space<vmem>>) attributes {dimension_semantics = [#tpu.dimension_semantics<parallel>], iteration_bounds = array<i64: 1>, scalar_prefetch = 0 : i64, scratch_operands = 0 : i64, tpu.core_type = #tpu.core_type<tc>, window_params = [{transform_indices = @transform_0, window_bounds = array<i64: 8, 16>}, {pipeline_mode = #tpu.pipeline_mode<synchronous>, transform_indices = @transform_1, window_bounds = array<i64: 16, 128>}, {pipeline_mode = #tpu.pipeline_mode<synchronous>, transform_indices = @transform_2, window_bounds = array<i64: 1, 128>}, {pipeline_mode = #tpu.pipeline_mode<synchronous>, transform_indices = @transform_3, window_bounds = array<i64: 128, 64>}, {pipeline_mode = #tpu.pipeline_mode<synchronous>, transform_indices = @transform_4, window_bounds = array<i64: 1, 64>}, {pipeline_mode = #tpu.pipeline_mode<synchronous>, transform_indices = @transform_5, window_bounds = array<i64: 64, 8>}, {pipeline_mode = #tpu.pipeline_mode<synchronous>, transform_indices = @transform_6, window_bounds = array<i64: 1, 8>}, {transform_indices = @transform_7, window_bounds = array<i64: 8, 8>}]} {
    %c0 = arith.constant 0 : index
    %c0_0 = arith.constant 0 : index
    %0 = vector.load %arg1[%c0, %c0_0] : memref<8x16xbf16, #tpu.memory_space<vmem>>, vector<8x16xbf16>
    %c0_1 = arith.constant 0 : index
    %c0_2 = arith.constant 0 : index
    %1 = vector.load %arg2[%c0_1, %c0_2] : memref<16x128xbf16, #tpu.memory_space<vmem>>, vector<16x128xbf16>
    %cst = arith.constant dense<0.000000e+00> : vector<8x128xf32>
    %2 = tpu.matmul %0, %1, %cst {dimension_numbers = #tpu.dot_dimension_numbers<[1], [0], [0], [1], [0, 0, 1, 1], [], []>} : vector<8x16xbf16>, vector<16x128xbf16>, vector<8x128xf32> -> vector<8x128xf32>
    %c0_3 = arith.constant 0 : index
    %c0_4 = arith.constant 0 : index
    %3 = vector.load %arg3[%c0_3, %c0_4] : memref<1x128xf32, #tpu.memory_space<vmem>>, vector<1x128xf32>
    %4 = vector.broadcast %3 : vector<1x128xf32> to vector<8x128xf32>
    %5 = arith.addf %2, %4 : vector<8x128xf32>
    %6 = math.tanh %5 : vector<8x128xf32>
    %7 = arith.truncf %6 : vector<8x128xf32> to vector<8x128xbf16>
    %c0_5 = arith.constant 0 : index
    %c0_6 = arith.constant 0 : index
    %8 = vector.load %arg4[%c0_5, %c0_6] : memref<128x64xbf16, #tpu.memory_space<vmem>>, vector<128x64xbf16>
    %cst_7 = arith.constant dense<0.000000e+00> : vector<8x64xf32>
    %9 = tpu.matmul %7, %8, %cst_7 {dimension_numbers = #tpu.dot_dimension_numbers<[1], [0], [0], [1], [0, 0, 1, 1], [], []>} : vector<8x128xbf16>, vector<128x64xbf16>, vector<8x64xf32> -> vector<8x64xf32>
    %c0_8 = arith.constant 0 : index
    %c0_9 = arith.constant 0 : index
    %10 = vector.load %arg5[%c0_8, %c0_9] : memref<1x64xf32, #tpu.memory_space<vmem>>, vector<1x64xf32>
    %11 = vector.broadcast %10 : vector<1x64xf32> to vector<8x64xf32>
    %12 = arith.addf %9, %11 : vector<8x64xf32>
    %13 = math.tanh %12 : vector<8x64xf32>
    %14 = arith.truncf %13 : vector<8x64xf32> to vector<8x64xbf16>
    %c0_10 = arith.constant 0 : index
    %c0_11 = arith.constant 0 : index
    %15 = vector.load %arg6[%c0_10, %c0_11] : memref<64x8xbf16, #tpu.memory_space<vmem>>, vector<64x8xbf16>
    %cst_12 = arith.constant dense<0.000000e+00> : vector<8x8xf32>
    %16 = tpu.matmul %14, %15, %cst_12 {dimension_numbers = #tpu.dot_dimension_numbers<[1], [0], [0], [1], [0, 0, 1, 1], [], []>} : vector<8x64xbf16>, vector<64x8xbf16>, vector<8x8xf32> -> vector<8x8xf32>
    %c0_13 = arith.constant 0 : index
    %c0_14 = arith.constant 0 : index
    %17 = vector.load %arg7[%c0_13, %c0_14] : memref<1x8xf32, #tpu.memory_space<vmem>>, vector<1x8xf32>
    %18 = vector.broadcast %17 : vector<1x8xf32> to vector<8x8xf32>
    %19 = arith.addf %16, %18 : vector<8x8xf32>
    %c0_15 = arith.constant 0 : index
    %c0_16 = arith.constant 0 : index
    %20 = vector.load %arg8[%c0_15, %c0_16] : memref<8x8xf32, #tpu.memory_space<vmem>>, vector<8x8xf32>
    tpu.vector_store %arg8[%c0_15, %c0_16], %19 {strides = array<i32>} : memref<8x8xf32, #tpu.memory_space<vmem>>, vector<8x8xf32>,
    return
  }
  func.func @transform_0(%arg0: i32) -> (i32, i32) {
    %c0_i32 = arith.constant 0 : i32
    %c0_i32_0 = arith.constant 0 : i32
    return %arg0, %c0_i32 : i32, i32
  }
  func.func @transform_1(%arg0: i32) -> (i32, i32) {
    %c0_i32 = arith.constant 0 : i32
    %c0_i32_0 = arith.constant 0 : i32
    %c0_i32_1 = arith.constant 0 : i32
    return %c0_i32, %c0_i32_0 : i32, i32
  }
  func.func @transform_2(%arg0: i32) -> (i32, i32) {
    %c0_i32 = arith.constant 0 : i32
    %c0_i32_0 = arith.constant 0 : i32
    %c0_i32_1 = arith.constant 0 : i32
    return %c0_i32, %c0_i32_0 : i32, i32
  }
  func.func @transform_3(%arg0: i32) -> (i32, i32) {
    %c0_i32 = arith.constant 0 : i32
    %c0_i32_0 = arith.constant 0 : i32
    %c0_i32_1 = arith.constant 0 : i32
    return %c0_i32, %c0_i32_0 : i32, i32
  }
  func.func @transform_4(%arg0: i32) -> (i32, i32) {
    %c0_i32 = arith.constant 0 : i32
    %c0_i32_0 = arith.constant 0 : i32
    %c0_i32_1 = arith.constant 0 : i32
    return %c0_i32, %c0_i32_0 : i32, i32
  }
  func.func @transform_5(%arg0: i32) -> (i32, i32) {
    %c0_i32 = arith.constant 0 : i32
    %c0_i32_0 = arith.constant 0 : i32
    %c0_i32_1 = arith.constant 0 : i32
    return %c0_i32, %c0_i32_0 : i32, i32
  }
  func.func @transform_6(%arg0: i32) -> (i32, i32) {
    %c0_i32 = arith.constant 0 : i32
    %c0_i32_0 = arith.constant 0 : i32
    %c0_i32_1 = arith.constant 0 : i32
    return %c0_i32, %c0_i32_0 : i32, i32
  }
  func.func @transform_7(%arg0: i32) -> (i32, i32) {
    %c0_i32 = arith.constant 0 : i32
    %c0_i32_0 = arith.constant 0 : i32
    return %arg0, %c0_i32 : i32, i32
  }
}

</mosaic_0001>

<bundles_post_ra>
// kernel: wavefunction_nn_forward.1
= control target key start
LH: loop header
LB: loop body
LE: loop exit
PB: predicated region body
PF: predicated region fallthrough
CT: control target
= control target key end

     0   :  { %vm40_vm0 = vcmask 130048   ;;  %vm178_vm1 = vcmask 523264   ;;  %vm195_vm2 = vcmask 64512   ;;  %s369_s1 = inlined_call_operand.vmem [shape: bf16[16,128], index: 1, kind: input, shape index: {}]   ;;  %s370_s0 = inlined_call_operand.vmem [shape: bf16[8,16], index: 0, kind: input, shape index: {}]   ;;  %s371_s3 = inlined_call_operand.vmem [shape: bf16[128,64], index: 3, kind: input, shape index: {}]   ;;  %s372_s2 = inlined_call_operand.vmem [shape: f32[1,128], index: 2, kind: input, shape index: {}]   ;;  %s373_s4 = inlined_call_operand.vmem [shape: f32[1,64], index: 4, kind: input, shape index: {}]   ;;  %s374_s5 = inlined_call_operand.vmem [shape: bf16[64,8], index: 5, kind: input, shape index: {}]   ;;  %s375_s6 = inlined_call_operand.vmem [shape: f32[1,8], index: 6, kind: input, shape index: {}]   ;;  %s376_s7 = inlined_call_operand.vmem [shape: f32[8,8], index: 7, kind: output, shape index: {}]  }
   0x1   :  { %v255_v0 = vld [vmem:[%s369_s1] sm:$0xff]  ;;  %v263_v1 = vld [vmem:[%s371_s3 + $0x38] sm:$0xff]  ;;  %v262_v3 = vld [vmem:[%s371_s3 + $0x30] sm:$0xff] }
   0x2   :  { %51 = vmatpush.bf16.msra.mxu0 %v255_v0  ;;  %v27_v2 = vld [vmem:[%s370_s0] sm:$0xf]  ;;  %127 = vmatpush.bf16.msra.mxu1 %v263_v1  ;;  %v261_v4 = vld [vmem:[%s371_s3 + $0x28] sm:$0xff]  ;;  %v259_v6 = vld [vmem:[%s371_s3 + $0x18] sm:$0xff] }
   0x3   :  { %v260_v5 = vld [vmem:[%s371_s3 + $0x20] sm:$0xff]  ;;  %v258_v7 = vld [vmem:[%s371_s3 + $0x10] sm:$0xff]  ;;  %v257_v8 = vld [vmem:[%s371_s3 + $0x8] sm:$0xff] }
   0x4   :  { %v256_v9 = vld [vmem:[%s371_s3] sm:$0xff]  ;;  %v267_v10 = vld [vmem:[%s374_s5 + $0x18] sm:$0xff]  ;;  %v266_v17 = vld [vmem:[%s374_s5 + $0x10] sm:$0xff] }
   0x5   :  { %205 = vmatmul.msk.bf16.vlgmr.msra.gmra.mxu0 %vm40_vm0, %v27_v2  ;;  %186 = vmatpush.bf16.msra.mxu2 %v267_v10  ;;  %v268_v11 = vld [vmem:[%s372_s2] ss:$0 sm:$0xff]  ;;  %v265_v18 = vld [vmem:[%s374_s5 + $0x8] sm:$0xff] }
   0x6   :  { %128 = vmatpush.bf16.msra.mxu1 %v262_v3  ;;  %v264_v19 = vld [vmem:[%s374_s5] sm:$0xff] }
   0x7   :  { %v269_v20 = vld [vmem:[%s373_s4] ss:$0 sm:$0xff] }
   0x8   :  { %v270_v26 = vld [vmem:[%s375_s6] ss:$0 sm:$0xff] }
   0x9   :  { %187 = vmatpush.bf16.msra.mxu2 %v266_v17 }
   0xa   :  { %129 = vmatpush.bf16.msra.mxu1 %v261_v4 }
   0xd   :  { %188 = vmatpush.bf16.msra.mxu2 %v265_v18 }
   0xe   :  { %130 = vmatpush.bf16.msra.mxu1 %v260_v5 }
  0x11   :  { %189 = vmatpush.bf16.msra.mxu2 %v264_v19 }
  0x12   :  { %131 = vmatpush.bf16.msra.mxu1 %v259_v6 }
  0x16   :  { %132 = vmatpush.bf16.msra.mxu1 %v258_v7 }
  0x1a   :  { %133 = vmatpush.bf16.msra.mxu1 %v257_v8 }
  0x1e   :  { %134 = vmatpush.bf16.msra.mxu1 %v256_v9 }
  0x82   :  { %v53_v12 = vpop.f32.mrf.mxu0 }
  0x83   :  { %v54_v13 = vadd.f32 %v268_v11, %v53_v12 }
  0x85   :  { %271 = vtanh.f32 %v54_v13 }
  0x8a   :  { %v55_v14 = vpop.f32.mrf.mxu0 }
  0x8b   :  { %v272_v15 = vpop.eup %271 }
  0x8c   :  { %v58_v16 = vpack.c.bf16 %v272_v15, %v272_v15 }
  0x8e   :  { %135 = vmatmul.bf16.vlgmr.msra.gmra.mxu1 %v58_v16 }
 0x10b   :  { %v136_v21 = vpop.f32.mrf.mxu1 }
 0x10c   :  { %v137_v22 = vadd.f32 %v269_v20, %v136_v21 }
 0x10e   :  { %273 = vtanh.f32 %v137_v22 }
 0x113   :  { %v138_v23 = vpop.f32.mrf.mxu1 }
 0x114   :  { %v274_v24 = vpop.eup %273 }
 0x115   :  { %v141_v25 = vpack.c.bf16 %v274_v24, %v274_v24 }
 0x117   :  { %254 = vmatmul.msk.bf16.vlgmr.msra.gmra.mxu2 %vm178_vm1, %v141_v25 }
 0x19a   :  { %v191_v27 = vpop.f32.mrf.mxu2 }
 0x19b   :  { %v192_v28 = vadd.f32 %v270_v26, %v191_v27 }
 0x19d   :  { %196 = vst.msk [vmem:[%s376_s7] sm:$0xff] %vm195_vm2, %v192_v28 }
 0x1a2   :  { %v193_v29 = vpop.f32.mrf.mxu2 }

</bundles_post_ra>
